<compile_context>
chip_gen: v6e
topology: v6e:2x2x1
jax: 0.10.0
libtpu: 0.0.40
codegen_flags: <defaults>
</compile_context>

<pallas_src>
import functools

import jax
import jax.numpy as jnp
from jax.experimental import pallas as pl
from jax.experimental.pallas import tpu as pltpu

BN_EPS = 1e-5
DROPOUT_P = 0.5
LANE = 128      # TPU lane width (last dim)
SUBLANE = 8     # f32 sublane width (second-to-last dim)


def _round_up(x, m):
    return (x + m - 1) // m * m


# ---------------------------------------------------------------------------
# Kernel 1: tiled GCN aggregation  H = (Ahat @ X) @ W  +  partial BN stats.
# ---------------------------------------------------------------------------
def gcn_aggregate_kernel(adj_ref, x_ref, w_ref, h_ref, pstats_ref, acc_ref):
    k = pl.program_id(1)

    @pl.when(k == 0)
    def _():
        acc_ref[...] = jnp.zeros_like(acc_ref)

    # bf16 MXU matmul, f32 accumulation:  acc += Ahat[i, k] @ X[k]
    acc_ref[...] += jnp.dot(adj_ref[...], x_ref[...],
                            preferred_element_type=jnp.float32)

    @pl.when(k == pl.num_programs(1) - 1)
    def _():
        # (Ahat @ X) @ W  -- second bf16 MXU matmul, once per row tile.
        h = jnp.dot(acc_ref[...].astype(w_ref.dtype), w_ref[...],
                    preferred_element_type=jnp.float32)
        h_ref[...] = h
        # Per-row-tile BN partial sums on the (otherwise idle) MXU via a
        # ones-row matmul instead of an XLU cross-sublane reduction.
        tm = h.shape[0]
        ones_row = jnp.ones((1, tm), jnp.float32)
        s1 = jnp.dot(ones_row, h, preferred_element_type=jnp.float32)
        s2 = jnp.dot(ones_row, h * h, preferred_element_type=jnp.float32)
        pad = jnp.zeros((6, h.shape[1]), jnp.float32)
        pstats_ref[...] = jnp.concatenate([s1, s2, pad], axis=0)[None, :, :]


# ---------------------------------------------------------------------------
# Kernel 2: BatchNorm (training batch stats) + SiLU + Dropout + Readout Linear.
# ---------------------------------------------------------------------------
def bn_silu_dropout_readout_kernel(pstats_ref, gamma_ref, beta_ref, h_ref,
                                   u_ref, wr_ref, br_ref, o_ref, *,
                                   inv_n, bn_eps, dropout_p, training):
    # Finalize batch statistics from the per-row-tile partial sums (biased var,
    # normalized by the true node count; zero padded rows contribute nothing).
    stats = jnp.sum(pstats_ref[...], axis=0)         # (8, F): row0=sum, row1=sumsq
    mean = stats[0:1, :] * inv_n                      # (1, F)
    var = stats[1:2, :] * inv_n - mean * mean         # (1, F)

    # Fused BN affine: one h*scale + shift pass (gamma/beta folded in).
    scale = gamma_ref[...] * jax.lax.rsqrt(var + bn_eps)
    shift = beta_ref[...] - mean * scale
    h = h_ref[...] * scale + shift

    # SiLU via the EUP logistic.
    h = h * jax.nn.sigmoid(h)

    # Inverted dropout, keep-prob = 1 - p.
    if training and dropout_p > 0.0:
        keep = u_ref[...] >= dropout_p
        h = jnp.where(keep, h * (1.0 / (1.0 - dropout_p)), 0.0)

    # ReadoutHead: Linear(hidden -> out), fused here (bf16 MXU, f32 accumulate).
    out = jnp.dot(h.astype(wr_ref.dtype), wr_ref[...],
                  preferred_element_type=jnp.float32)
    o_ref[...] = (out + br_ref[...]).astype(o_ref.dtype)


# ---------------------------------------------------------------------------
# Plain-JAX glue.
# ---------------------------------------------------------------------------
def gcn_norm_dense(edge_index, num_nodes):
    """Dense D^-1/2 (A + I) D^-1/2; A[dst, src] = 1 per edge (PyG convention)."""
    # TODO(synk): for large sparse graphs replace this dense O(N^2) adjacency
    # with CSR neighbor lists gathered via PrefetchScalarGridSpec / manual DMA.
    src, dst = edge_index[0], edge_index[1]
    adj = jnp.zeros((num_nodes, num_nodes), jnp.float32).at[dst, src].add(1.0)
    adj = adj + jnp.eye(num_nodes, dtype=jnp.float32)
    deg = adj.sum(axis=1)
    dinv = jax.lax.rsqrt(deg)
    return dinv[:, None] * adj * dinv[None, :]


def _pad2(a, rows, cols):
    r, c = a.shape
    return jnp.pad(a, ((0, rows - r), (0, cols - c)))


def gnn_forward(x, edge_index, w1, gamma, beta, w_r, b_r, *, dropout_key,
                training=True, dropout_p=DROPOUT_P, tm=128, tk=128):
    """GNN.forward: readout(Dropout(SiLU(BN(GCNConv(x, edge_index)))))."""
    n, f_in = x.shape
    f_hid = w1.shape[1]
    f_out = w_r.shape[1]

    # ---- tile / padding choices (lane-dense, (8,128)-aligned) ----
    f_in_p = _round_up(f_in, LANE)
    f_hid_p = _round_up(f_hid, LANE)
    f_out_p = _round_up(f_out, LANE)
    if n <= tk:                                   # small graph: single k step
        tm = min(tm, _round_up(n, SUBLANE))
        n_pad = _round_up(n, tm)
        tk = n_pad
    else:
        assert tk % LANE == 0 and tm % SUBLANE == 0
        step = tk if tk % tm == 0 else tm * tk
        n_pad = _round_up(n, step)
    rows = n_pad // tm
    kt = n_pad // tk
    # Tile VMEM budget at defaults (~0.5 MiB incl. double buffering) leaves
    # ample headroom even under v7x's 64 MiB physical / 32 MiB scoped VMEM.

    # ---- adjacency, padding, bf16 casts for the MXU (f32 accumulation) ----
    adj_p = _pad2(gcn_norm_dense(edge_index, n), n_pad, n_pad).astype(jnp.bfloat16)
    x_p = _pad2(x.astype(jnp.float32), n_pad, f_in_p).astype(jnp.bfloat16)
    w1_p = _pad2(w1, f_in_p, f_hid_p).astype(jnp.bfloat16)
    gamma_p = _pad2(gamma.reshape(1, -1), 1, f_hid_p).astype(jnp.float32)
    beta_p = _pad2(beta.reshape(1, -1), 1, f_hid_p).astype(jnp.float32)
    wr_p = _pad2(w_r, f_hid_p, f_out_p).astype(jnp.bfloat16)
    br_p = _pad2(b_r.reshape(1, -1), 1, f_out_p).astype(jnp.float32)
    # NOTE: GCNConv bias omitted on purpose -- exactly cancelled by the
    # training-mode BatchNorm mean subtraction.

    # Dropout randomness, precomputed host-side.
    # TODO(synk): in-kernel pltpu.prng_seed/prng_random_bits would avoid this
    # (n_pad, f_hid_p) HBM stream but has no interpret-mode lowering.
    if training and dropout_p > 0.0:
        u = jax.random.uniform(dropout_key, (n_pad, f_hid_p), jnp.float32)
    else:
        u = jnp.ones((n_pad, f_hid_p), jnp.float32)

    # ---- kernel 1: tiled GCN aggregation + partial BN stats ----
    h, pstats = pl.pallas_call(
        gcn_aggregate_kernel,
        out_shape=(jax.ShapeDtypeStruct((n_pad, f_hid_p), jnp.float32),
                   jax.ShapeDtypeStruct((rows, 8, f_hid_p), jnp.float32)),
        grid=(rows, kt),
        in_specs=[
            pl.BlockSpec((tm, tk), lambda i, k: (i, k)),            # Ahat tile
            pl.BlockSpec((tk, f_in_p), lambda i, k: (k, 0)),        # X tile
            pl.BlockSpec((f_in_p, f_hid_p), lambda i, k: (0, 0)),   # W (resident)
        ],
        out_specs=(
            pl.BlockSpec((tm, f_hid_p), lambda i, k: (i, 0)),       # H row tile
            pl.BlockSpec((1, 8, f_hid_p), lambda i, k: (i, 0, 0)),  # partial stats
        ),
        scratch_shapes=[pltpu.VMEM((tm, f_in_p), jnp.float32)],
        compiler_params=pltpu.CompilerParams(
            dimension_semantics=("parallel", "arbitrary")),
    )(adj_p, x_p, w1_p)

    # ---- kernel 2: BN + SiLU + dropout + readout Linear (lane-dense output) ----
    kernel2 = functools.partial(
        bn_silu_dropout_readout_kernel,
        inv_n=1.0 / float(n), bn_eps=BN_EPS,
        dropout_p=float(dropout_p), training=bool(training))
    out_p = pl.pallas_call(
        kernel2,
        out_shape=jax.ShapeDtypeStruct((n_pad, f_out_p), jnp.float32),
        grid=(rows,),
        in_specs=[
            pl.BlockSpec((rows, 8, f_hid_p), lambda i: (0, 0, 0)),  # partial stats
            pl.BlockSpec((1, f_hid_p), lambda i: (0, 0)),           # gamma
            pl.BlockSpec((1, f_hid_p), lambda i: (0, 0)),           # beta
            pl.BlockSpec((tm, f_hid_p), lambda i: (i, 0)),          # H row tile
            pl.BlockSpec((tm, f_hid_p), lambda i: (i, 0)),          # dropout uniforms
            pl.BlockSpec((f_hid_p, f_out_p), lambda i: (0, 0)),     # readout W
            pl.BlockSpec((1, f_out_p), lambda i: (0, 0)),           # readout b
        ],
        out_specs=pl.BlockSpec((tm, f_out_p), lambda i: (i, 0)),
        compiler_params=pltpu.CompilerParams(
            dimension_semantics=("parallel",)),
    )(pstats, gamma_p, beta_p, h, u, wr_p, br_p)

    return out_p[:n, :f_out]


if __name__ == "__main__":
    # Small but grid-exercising shapes: 160 nodes (padded to 256 -> 2x2 tile
    # grid), input_dim = hidden_dim = 32, output_dim = 16.
    N, F_IN, F_HID, F_OUT = 160, 32, 32, 16

    key = jax.random.PRNGKey(0)
    k_x, k_w1, k_wr, k_drop = jax.random.split(key, 4)

    # node features
    x = jax.random.normal(k_x, (N, F_IN), dtype=jnp.float32)

    # deterministic bidirectional ring graph: edge_index shape (2, 2N)
    idx = jnp.arange(N, dtype=jnp.int32)
    src = jnp.concatenate([idx, (idx + 1) % N])
    dst = jnp.concatenate([(idx + 1) % N, idx])
    edge_index = jnp.stack([src, dst], axis=0)

    # GCNConv weight (glorot-uniform); bias dropped (cancelled by training BN)
    lim1 = (6.0 / (F_IN + F_HID)) ** 0.5
    w1 = jax.random.uniform(k_w1, (F_IN, F_HID), jnp.float32, -lim1, lim1)

    # BatchNorm1d parameters (default init)
    gamma = jnp.ones((F_HID,), jnp.float32)
    beta = jnp.zeros((F_HID,), jnp.float32)

    # ReadoutHead Linear parameters
    limr = (1.0 / F_HID) ** 0.5
    w_r = jax.random.uniform(k_wr, (F_HID, F_OUT), jnp.float32, -limr, limr)
    b_r = jnp.zeros((F_OUT,), jnp.float32)

    out = gnn_forward(x, edge_index, w1, gamma, beta, w_r, b_r,
                      dropout_key=k_drop, training=True, dropout_p=DROPOUT_P)
    jax.block_until_ready(out)
    assert out.shape == (N, F_OUT) and out.dtype == jnp.float32
    assert bool(jnp.all(jnp.isfinite(out)))
    print("KERNEL_OK")
</pallas_src>

<mosaic_0001>
module attributes {stable_mosaic.version = 11 : i64} {
  func.func @gcn_aggregate_kernel(%arg0: i32, %arg1: i32, %arg2: memref<128x128xbf16, #tpu.memory_space<vmem>>, %arg3: memref<128x128xbf16, #tpu.memory_space<vmem>>, %arg4: memref<128x128xbf16, #tpu.memory_space<vmem>>, %arg5: memref<128x128xf32, #tpu.memory_space<vmem>>, %arg6: memref<1x8x128xf32, #tpu.memory_space<vmem>>, %arg7: memref<128x128xf32, #tpu.memory_space<vmem>>) attributes {dimension_semantics = [#tpu.dimension_semantics<parallel>, #tpu.dimension_semantics<arbitrary>], iteration_bounds = array<i64: 2, 2>, scalar_prefetch = 0 : i64, scratch_operands = 1 : i64, tpu.core_type = #tpu.core_type<tc>, window_params = [{transform_indices = @transform_0, window_bounds = array<i64: 128, 128>}, {transform_indices = @transform_1, window_bounds = array<i64: 128, 128>}, {pipeline_mode = #tpu.pipeline_mode<synchronous>, transform_indices = @transform_2, window_bounds = array<i64: 128, 128>}, {transform_indices = @transform_3, window_bounds = array<i64: 128, 128>}, {transform_indices = @transform_4, window_bounds = array<i64: 1, 8, 128>}]} {
    %c0_i32 = arith.constant 0 : i32
    %0 = arith.cmpi eq, %arg1, %c0_i32 : i32
    %1 = arith.extui %0 : i1 to i32
    %c0_i32_0 = arith.constant 0 : i32
    %2 = arith.cmpi ne, %1, %c0_i32_0 : i32
    scf.if %2 {
      %cst_9 = arith.constant 0.000000e+00 : f32
      %12 = vector.broadcast %cst_9 : f32 to vector<128x128xf32>
      %c0_10 = arith.constant 0 : index
      %c0_11 = arith.constant 0 : index
      %13 = vector.load %arg7[%c0_10, %c0_11] : memref<128x128xf32, #tpu.memory_space<vmem>>, vector<128x128xf32>
      tpu.vector_store %arg7[%c0_10, %c0_11], %12 {strides = array<i32>} : memref<128x128xf32, #tpu.memory_space<vmem>>, vector<128x128xf32>,
    } else {
    }
    %c0 = arith.constant 0 : index
    %c0_1 = arith.constant 0 : index
    %3 = vector.load %arg7[%c0, %c0_1] : memref<128x128xf32, #tpu.memory_space<vmem>>, vector<128x128xf32>
    %c0_2 = arith.constant 0 : index
    %c0_3 = arith.constant 0 : index
    %4 = vector.load %arg2[%c0_2, %c0_3] : memref<128x128xbf16, #tpu.memory_space<vmem>>, vector<128x128xbf16>
    %c0_4 = arith.constant 0 : index
    %c0_5 = arith.constant 0 : index
    %5 = vector.load %arg3[%c0_4, %c0_5] : memref<128x128xbf16, #tpu.memory_space<vmem>>, vector<128x128xbf16>
    %cst = arith.constant dense<0.000000e+00> : vector<128x128xf32>
    %6 = tpu.matmul %4, %5, %cst {dimension_numbers = #tpu.dot_dimension_numbers<[1], [0], [0], [1], [0, 0, 1, 1], [], []>} : vector<128x128xbf16>, vector<128x128xbf16>, vector<128x128xf32> -> vector<128x128xf32>
    %7 = arith.addf %3, %6 : vector<128x128xf32>
    %c0_6 = arith.constant 0 : index
    %c0_7 = arith.constant 0 : index
    %8 = vector.load %arg7[%c0_6, %c0_7] : memref<128x128xf32, #tpu.memory_space<vmem>>, vector<128x128xf32>
    tpu.vector_store %arg7[%c0_6, %c0_7], %7 {strides = array<i32>} : memref<128x128xf32, #tpu.memory_space<vmem>>, vector<128x128xf32>,
    %c1_i32 = arith.constant 1 : i32
    %9 = arith.cmpi eq, %arg1, %c1_i32 : i32
    %10 = arith.extui %9 : i1 to i32
    %c0_i32_8 = arith.constant 0 : i32
    %11 = arith.cmpi ne, %10, %c0_i32_8 : i32
    scf.if %11 {
      %c0_9 = arith.constant 0 : index
      %c0_10 = arith.constant 0 : index
      %12 = vector.load %arg7[%c0_9, %c0_10] : memref<128x128xf32, #tpu.memory_space<vmem>>, vector<128x128xf32>
      %13 = arith.truncf %12 : vector<128x128xf32> to vector<128x128xbf16>
      %c0_11 = arith.constant 0 : index
      %c0_12 = arith.constant 0 : index
      %14 = vector.load %arg4[%c0_11, %c0_12] : memref<128x128xbf16, #tpu.memory_space<vmem>>, vector<128x128xbf16>
      %cst_13 = arith.constant dense<0.000000e+00> : vector<128x128xf32>
      %15 = tpu.matmul %13, %14, %cst_13 {dimension_numbers = #tpu.dot_dimension_numbers<[1], [0], [0], [1], [0, 0, 1, 1], [], []>} : vector<128x128xbf16>, vector<128x128xbf16>, vector<128x128xf32> -> vector<128x128xf32>
      %c0_14 = arith.constant 0 : index
      %c0_15 = arith.constant 0 : index
      %16 = vector.load %arg5[%c0_14, %c0_15] : memref<128x128xf32, #tpu.memory_space<vmem>>, vector<128x128xf32>
      tpu.vector_store %arg5[%c0_14, %c0_15], %15 {strides = array<i32>} : memref<128x128xf32, #tpu.memory_space<vmem>>, vector<128x128xf32>,
      %cst_16 = arith.constant 1.000000e+00 : f32
      %17 = vector.broadcast %cst_16 : f32 to vector<1x128xf32>
      %cst_17 = arith.constant dense<0.000000e+00> : vector<1x128xf32>
      %18 = tpu.matmul %17, %15, %cst_17 {dimension_numbers = #tpu.dot_dimension_numbers<[1], [0], [0], [1], [0, 0, 1, 1], [], []>} : vector<1x128xf32>, vector<128x128xf32>, vector<1x128xf32> -> vector<1x128xf32>
      %19 = arith.mulf %15, %15 : vector<128x128xf32>
      %cst_18 = arith.constant dense<0.000000e+00> : vector<1x128xf32>
      %20 = tpu.matmul %17, %19, %cst_18 {dimension_numbers = #tpu.dot_dimension_numbers<[1], [0], [0], [1], [0, 0, 1, 1], [], []>} : vector<1x128xf32>, vector<128x128xf32>, vector<1x128xf32> -> vector<1x128xf32>
      %cst_19 = arith.constant 0.000000e+00 : f32
      %21 = vector.broadcast %cst_19 : f32 to vector<6x128xf32>
      %22 = tpu.concatenate %18, %20, %21 in 0 : vector<1x128xf32>, vector<1x128xf32>, vector<6x128xf32> -> vector<8x128xf32>
      %23 = vector.shape_cast %22 : vector<8x128xf32> to vector<1x8x128xf32>
      %c0_20 = arith.constant 0 : index
      %c0_21 = arith.constant 0 : index
      %c0_22 = arith.constant 0 : index
      %24 = vector.load %arg6[%c0_20, %c0_21, %c0_22] : memref<1x8x128xf32, #tpu.memory_space<vmem>>, vector<1x8x128xf32>
      tpu.vector_store %arg6[%c0_20, %c0_21, %c0_22], %23 {strides = array<i32>} : memref<1x8x128xf32, #tpu.memory_space<vmem>>, vector<1x8x128xf32>,
    } else {
    }
    return
  }
  func.func @transform_0(%arg0: i32, %arg1: i32) -> (i32, i32) {
    %c0_i32 = arith.constant 0 : i32
    return %arg0, %arg1 : i32, i32
  }
  func.func @transform_1(%arg0: i32, %arg1: i32) -> (i32, i32) {
    %c0_i32 = arith.constant 0 : i32
    %c0_i32_0 = arith.constant 0 : i32
    return %arg1, %c0_i32 : i32, i32
  }
  func.func @transform_2(%arg0: i32, %arg1: i32) -> (i32, i32) {
    %c0_i32 = arith.constant 0 : i32
    %c0_i32_0 = arith.constant 0 : i32
    %c0_i32_1 = arith.constant 0 : i32
    return %c0_i32, %c0_i32_0 : i32, i32
  }
  func.func @transform_3(%arg0: i32, %arg1: i32) -> (i32, i32) {
    %c0_i32 = arith.constant 0 : i32
    %c0_i32_0 = arith.constant 0 : i32
    return %arg0, %c0_i32 : i32, i32
  }
  func.func @transform_4(%arg0: i32, %arg1: i32) -> (i32, i32, i32) {
    %c0_i32 = arith.constant 0 : i32
    %c0_i32_0 = arith.constant 0 : i32
    %c0_i32_1 = arith.constant 0 : i32
    return %arg0, %c0_i32, %c0_i32_0 : i32, i32, i32
  }
}

</mosaic_0001>

<bundles_post_ra>
// kernel: tpu_custom_call.1
= control target key start
LH: loop header
LB: loop body
LE: loop exit
PB: predicated region body
PF: predicated region fallthrough
CT: control target
= control target key end

     0   :  { %s2343_s0 = inlined_call_operand.hbm [shape: bf16[256,256], index: 0, kind: input, shape index: {}]   ;;  %s2344_s1 = inlined_call_operand.hbm [shape: bf16[256,128], index: 1, kind: input, shape index: {}]   ;;  %s2345_s2 = inlined_call_operand.hbm [shape: bf16[128,128], index: 2, kind: input, shape index: {}]   ;;  %s2346_s3 = inlined_call_operand.hbm [shape: f32[256,128], index: 3, kind: output, shape index: {0}]   ;;  %s2347_s4 = inlined_call_operand.hbm [shape: f32[2,8,128], index: 4, kind: output, shape index: {1}]  }
   0x1   :  { %2370 = sst [smem:[#allocation27_spill]] %s2343_s0 }
   0x2   :  { %2371 = sst [smem:[#allocation28_spill]] %s2344_s1 }
   0x3   :  { %2372 = sst [smem:[#allocation29_spill]] %s2345_s2 }
   0x4   :  { %2373 = sst [smem:[#allocation30_spill]] %s2346_s3 }
   0x5   :  { %2374 = sst [smem:[#allocation31_spill]] %s2347_s4 }
   0x6   :  { %10 = vsyncpa [#allocation4], 0 }
   0x7   :  { %12 = vsyncpa [#allocation4 + $0x1], 0 }
   0x8   :  { %13 = vsyncpa [#allocation7], 0 }
   0x9   :  { %15 = vsyncpa [#allocation7 + $0x1], 0 }
   0xa   :  { %16 = vsyncpa [#allocation5], 0 }
   0xb   :  { %18 = vsyncpa [#allocation5 + $0x1], 0 }
   0xc   :  { %19 = vsyncpa [#allocation11], 0 }
   0xd   :  { %21 = vsyncpa [#allocation11 + $0x1], 0  ;;  %s1900_s15 = smov 0   ;;  %s1902_s16 = smov 0  }
   0xe   :  { %s1904_s17 = smov 0   ;;  %s1906_s18 = smov 0  }
   0xf   :  { %s1908_s19 = smov 0   ;;  %s1910_s20 = smov 0  }
  0x10   :  { %s1912_s21 = smov 0   ;;  %s1914_s22 = smov 0  }
  0x11   :  { %s1916_s23 = smov 0   ;;  %s1918_s24 = smov 0  }
  0x12   :  { %s1920_s25 = smov 0   ;;  %s1922_s26 = smov 0  }
  0x13   :  { %s1924_s27 = smov 0   ;;  %s1926_s28 = smov 0  }
  0x14 LB: > { %2375 = sst [smem:[#allocation17_spill]] %s1807_s15  ;;  %s1967_s29 = sadd.s32 4294967295, %s1859_s28   ;;  %s1859_s28 = sphi %s1926_s28, %s27_s28   ;;  %s1855_s27 = sphi %s1924_s27, %s2434_s27   ;;  %s1851_s26 = sphi %s1922_s26, %s2433_s26   ;;  %s1847_s25 = sphi %s1920_s25, %s2432_s25   ;;  %s1843_s24 = sphi %s1918_s24, %s2431_s24   ;;  %s1839_s23 = sphi %s1916_s23, %s2430_s23   ;;  %s1835_s22 = sphi %s1914_s22, %s2429_s22   ;;  %s1831_s21 = sphi %s1912_s21, %s2428_s21   ;;  %s1827_s20 = sphi %s1910_s20, %s2427_s20   ;;  %s1823_s19 = sphi %s1908_s19, %s2426_s19   ;;  %s1819_s18 = sphi %s1906_s18, %s2425_s18   ;;  %s1815_s17 = sphi %s1904_s17, %s2424_s17   ;;  %s1811_s16 = sphi %s1902_s16, %s2423_s16   ;;  %s1807_s15 = sphi %s1900_s15, %s2422_s15  }
  0x15   : > { %2376 = sst [smem:[#allocation18_spill]] %s1811_s16  ;;  %s1146_s30 = sadd.s32 4294967294, %s1859_s28  }
  0x16   : > { %2377 = sst [smem:[#allocation19_spill]] %s1843_s24  ;;  %p61_p0 = scmp.ne.s32.totalorder %s1835_s22, %s1831_s21 }
  0x17   : > { %2378 = sst [smem:[#allocation20_spill]] %s1847_s25  ;;  %p2367_p1 = scmp.eq.s32.totalorder %s1967_s29, 0 }
  0x18   : > { %2379 = sst [smem:[#allocation21_spill]] %s1967_s29  ;;  %p87_p2 = scmp.ne.s32.totalorder %s1823_s19, %s1819_s18 }
  0x19   : > { %p1976_p3 = por %p2367_p1, %p61_p0  ;;  %p131_p4 = scmp.ne.s32.totalorder %s1815_s17, %s1811_s16 }
  0x1a   : > { %p1984_p5 = por %p87_p2, %p2367_p1  ;;  %p132_p6 = scmp.eq.s32.totalorder %s1967_s29, 3 }
  0x1b   : > { %p137_p7 = scmp.ne.s32.totalorder %s1811_s16, %s1807_s15  ;;  %p138_p8 = scmp.eq.s32.totalorder %s1146_s30, 3 }
  0x1c   : > { %s2381_s7 = scalar_select %p1984_p5, 1, 0 }
  0x1d   : > { %p1991_p9 = por %p132_p6, %p131_p4  ;;  %p1147_p10 = scmp.ge.s32.totalorder %s1859_s28, 1 }
  0x1e   : > { %2382 = sst [smem:[#allocation22_spill]] %s2381_s7  ;;  %p1996_p11 = por %p138_p8, %p137_p7 }
  0x1f   : > { %s2383_s8 = scalar_select %p1991_p9, 1, 0 }
  0x20   : > { %s2385_s9 = scalar_select %p1996_p11, 1, 0 }
  0x21   : > { %2384 = sst [smem:[#allocation23_spill]] %s2383_s8  ;;  %p171_p12 = scmp.lt.s32.totalorder %s1859_s28, 5 }
  0x22   : > { %2386 = sst [smem:[#allocation24_spill]] %s2385_s9  ;;  %s1861_s11 = smov [#allocation8]  }
  0x23   : > { %p2001_p13 = pnand %p1147_p10, %p171_p12  ;;  %s183_s12 = sshll.u32 %s1861_s11, 4  ;;  %s184_s12 = int_to_ptr.vmem [resolvable:$true] %s183_s12 }
  0x24   : > { %s1606_s13 = scalar_lea.vmem %s184_s12, 1024  ;;  %p1614_p9 = scmp.lt.s32.totalorder %s184_s12, %s184_s12 }
  0x25   : > { %p1427_p0 = pneg %p2001_p13  ;;  %p1607_p6 = scmp.ne.s32.totalorder %s184_s12, %s1606_s13 }
  0x26   : > { %p1615_p11 = scmp.lt.s32.totalorder %s1606_s13, %s1606_s13 }
  0x27   : > { %p1428_p2 = pnand %p1427_p0, %p2367_p1 }
  0x28   : > { %p1616_p5 = por %p1615_p11, %p1614_p9 }
  0x29   : > { %p1597_p4 = pneg %p1428_p2 }
  0x2b   : > { %p1609_p7 = pnand %p1607_p6, %p1597_p4 }
  0x2d   : > { %p1610_p8 = pneg %p1609_p7 }
  0x2f   : > { %p1617_p10 = pnand %p1616_p5, %p1610_p8 }
  0x31   : > { %1620 = shalt.err (!%p1617_p10)
}
  0x32   : > { %s2351_s14 = smov 64   ;;  %s2353_s18 = smov 4  }
  0x33   : > { %s2388_s2 = sld [smem:[#allocation29_spill]]  ;;  %s36_s11 = sadd.s32 1, %s1851_s26 }
  0x34   : > { %p37_p5 = scmp.ge.s32.totalorder %s36_s11, 2  ;;  %s39_s13 = sadd.s32 1, %s1855_s27 }
  0x35   : > { %s48_s5 = sadd.s32 1, %s1839_s23  ;;  %p55_p9 = scmp.ne.s32.totalorder %s1839_s23, %s1835_s22 }
  0x36   : > { %s2436_s11 = smov (%p37_p5, %s36_s11), 0  ;;  %s2438_s13 = smov (!%p37_p5, %s39_s13), %s1855_s27 }
  0x37   : > { %2389 = sst [smem:[#allocation25_spill]] %s2436_s11  ;;  %s2025_s9 = ssub.s32 %s1851_s26, %s2436_s11 }
  0x38   : > { %p56_p11 = scmp.eq.s32.totalorder %s1859_s28, 0  ;;  %p41_p12 = scmp.ge.s32.totalorder %s2438_s13, 2 }
  0x39   : > { %1430 = dma.hbm_to_vmem [thread:$0]  (!%p1428_p2), %s2388_s2, 1024, %s184_s12, [#allocation7], %s2351_s14, %s2351_s14, %s2353_s18  }
  0x3a   : > { %p72_p0 = scmp.eq.s32.totalorder %s2025_s9, 0  ;;  %p2031_p2 = por %p56_p11, %p55_p9 }
  0x3b   : > { %p1446_p4 = scmp.lt.s32.totalorder %s1859_s28, 4  ;;  %s2440_s13 = smov (%p41_p12, %s2438_s13), 0 }
  0x3c   : > { %2391 = sst [smem:[#allocation26_spill]] %s2440_s13  ;;  %s197_s21 = sand.u32 1, %s1839_s23  }
  0x3d   : > { %s1196_s30 = sshll.u32 %s1855_s27, 5  ;;  %s43_s14 = ssub.s32 %s1855_s27, %s2440_s13 }
  0x3e   : > { %s45_s18 = sor.u32 %s2025_s9, %s43_s14  ;;  %p119_p6 = scmp.eq.s32.totalorder %s43_s14, 0 }
  0x3f   : > { %p46_p7 = scmp.eq.s32.totalorder %s45_s18, 0  ;;  %s1150_s2 = sshll.u32 %s197_s21, 6 }
  0x40   : > { %s2392_s11 = sadd.s32 1, %s1815_s17  ;;  %s207_s3 = sadd.s32 %s1851_s26, %s1196_s30 }
  0x41   : > { %s2046_s15 = scalar_select %p119_p6, %s1815_s17, %s2392_s11  }
  0x42   : > { %s2049_s4 = scalar_select %p46_p7, %s1839_s23, %s48_s5  }
  0x43   : > { %s1153_s8 = sshll.u32 %s207_s3, 6  ;;  %s201_s25 = scalar_lea.vmem [#allocation3], %s1150_s2 }
  0x44   : > { %s210_s24 = sshll.u32 %s201_s25, 4  ;;  %s2393_s0 = sld [smem:[#allocation27_spill]]  ;;  %s211_s24 = int_to_ptr.vmem [resolvable:$true] %s210_s24 }
  0x45   : > { %p2059_p8 = pnand %p1446_p4, %p2031_p2  ;;  %s198_s11 = scalar_lea.sflag [#allocation4], %s197_s21 }
  0x46   : > { %s1634_s5 = scalar_lea.vmem %s211_s24, 1024  ;;  %s1864_s2 = smov [#allocation3]  }
  0x47   : > { %p1623_p10 = pneg %p2059_p8  ;;  %p1635_p5 = scmp.ne.s32.totalorder %s211_s24, %s1634_s5 }
  0x48   : > { %s1639_s3 = sshll.u32 %s1864_s2, 4  ;;  %s1640_s3 = int_to_ptr.vmem [resolvable:$false] %s1639_s3 }
  0x49   : > { %p1637_p9 = pnand %p1635_p5, %p1623_p10  ;;  %s1641_s16 = scalar_lea.vmem %s1640_s3, 2048 }
  0x4a   : > { %s209_s29 = scalar_lea.hbm %s2393_s0, %s1153_s8  ;;  %p1642_p6 = scmp.lt.s32.totalorder %s211_s24, %s1640_s3 }
  0x4b   : > { %p1638_p12 = pneg %p1637_p9  ;;  %p1643_p7 = scmp.lt.s32.totalorder %s1641_s16, %s1634_s5 }
  0x4d   : > { %p1644_p1 = por %p1643_p7, %p1642_p6 }
  0x4f   : > { %p1645_p2 = pnand %p1644_p1, %p1638_p12 }
  0x51   : > { %1648 = shalt.err (!%p1645_p2)
}
  0x52   : > { %s1865_s25 = smov 128   ;;  %s2395_s7 = smov 4  }
  0x53   : > { %s2396_s8 = smov 64   ;;  %s74_s12 = sadd.s32 1, %s1827_s20 }
  0x54   : > { %1434 = dma.hbm_to_vmem [thread:$0]  (!%p2059_p8), %s209_s29, 1024, %s211_s24, %s198_s11, %s1865_s25, %s2396_s8, %s2395_s7  }
  0x55   : > { %p81_p10 = scmp.ne.s32.totalorder %s1827_s20, %s1823_s19  ;;  %s222_s30 = sand.u32 1, %s1827_s20  }
  0x56   : > { %s2076_s21 = scalar_select %p72_p0, %s1827_s20, %s74_s12  }
  0x57   : > { %p83_p1 = por %p81_p10, %p56_p11  ;;  %s1197_s14 = sshll.u32 %s1851_s26, 10 }
  0x58   : > { %s1154_s5 = sshll.u32 %s222_s30, 6  ;;  %s2397_s1 = sld [smem:[#allocation28_spill]] }
  0x59   : > { %p2087_p5 = pnand %p1446_p4, %p83_p1  ;;  %s224_s24 = scalar_lea.vmem [#allocation6], %s1154_s5 }
  0x5a   : > { %s231_s29 = sshll.u32 %s224_s24, 4  ;;  %s2399_s9 = sand.u32 1, %s1859_s28   ;;  %s232_s29 = int_to_ptr.vmem [resolvable:$true] %s231_s29 }
  0x5b   : > { %s221_s11 = scalar_lea.sflag [#allocation7], %s2399_s9  ;;  %p1651_p11 = pneg %p2087_p5 }
  0x5c   : > { %s1662_s25 = scalar_lea.vmem %s232_s29, 1024  ;;  %s1866_s12 = smov [#allocation6]  }
  0x5d   : > { %p1663_p0 = scmp.ne.s32.totalorder %s232_s29, %s1662_s25  ;;  %s1667_s30 = sshll.u32 %s1866_s12, 4  ;;  %s1668_s30 = int_to_ptr.vmem [resolvable:$false] %s1667_s30 }
  0x5e   : > { %s230_s16 = scalar_lea.hbm %s2397_s1, %s1197_s14  ;;  %s1669_s14 = scalar_lea.vmem %s1668_s30, 2048 }
  0x5f   : > { %p1665_p8 = pnand %p1663_p0, %p1651_p11  ;;  %p1670_p4 = scmp.lt.s32.totalorder %s232_s29, %s1668_s30 }
  0x60   : > { %p1671_p12 = scmp.lt.s32.totalorder %s1669_s14, %s1662_s25 }
  0x61   : > { %p1666_p9 = pneg %p1665_p8 }
  0x62   : > { %p1672_p6 = por %p1671_p12, %p1670_p4 }
  0x64   : > { %p1673_p7 = pnand %p1672_p6, %p1666_p9 }
  0x66   : > { %1676 = shalt.err (!%p1673_p7)
}
  0x67   : > { %1437 = dma.hbm_to_vmem [thread:$0]  (!%p2087_p5), %s230_s16, 1024, %s232_s29, %s221_s11, %s2396_s8, %s2396_s8, %s2395_s7  }
  0x68   : > { %243 = sbr.rel (%p2001_p13) target bundleno = 928 (0x3a0), region = 32  ;;  %s245_s5 = sand.u32 (!%p2001_p13), 1, %s1835_s22  }
  0x69   : > { %s1158_s2 = sshll.u32 (!%p2001_p13), %s245_s5, 6  ;;  %s246_s3 = scalar_lea.sflag (!%p2001_p13), [#allocation4], %s245_s5 }
  0x6a   : > { %s2103_s24 = scalar_lea.vmem (!%p2001_p13), [#allocation3], %s1158_s2 }
  0x6d   : > { %1786 = dma.done.wait (%p1976_p3), %s246_s3, 1024  }
  0x6e   : > { %1788 = vsyncadd (%p1976_p3), %s246_s3, 4294966272  ;;  %s2400_s18 = sld [smem:[#allocation21_spill]]  ;;  %s256_s7 = sand.u32 1, %s1823_s19  }
  0x6f   : > { %s2401_s9 = sld [smem:[#allocation22_spill]]  ;;  %s1159_s8 = sshll.u32 %s256_s7, 6 }
  0x70   : > { %s2111_s16 = scalar_lea.vmem [#allocation6], %s1159_s8 }
  0x74   : > { %s254_s25 = sand.u32 1, %s2400_s18  }
  0x75   : > { %s255_s10 = scalar_lea.sflag [#allocation7], %s254_s25  ;;  %p2402_p13 = scmp.ne.s32.totalorder %s2401_s9, 0 }
  0x77   : > { %1790 = dma.done.wait (%p2402_p13), %s255_s10, 1024  }
  0x78   : > { %1792 = vsyncadd (%p2402_p13), %s255_s10, 4294966272  ;;  %p2403_p2 = scmp.eq.s32.totalorder %s2400_s18, 0 }
  0x7a   : > { %1794 = dma.done.wait (%p2403_p2), [#allocation7], 1024   ;;  %p2404_p10 = pmov %p2403_p2 }
  0x7b   : > { %s2405_s6 = sld [smem:[#allocation18_spill]] }
  0x7c   : > { %1796 = vsyncadd (%p2404_p10), [#allocation7], 4294966272  ;;  %s2406_s5 = sld [smem:[#allocation19_spill]] }
  0x81   : > { %s2122_s29 = sand.u32 1, %s2405_s6  }
  0x82   : > { %s1161_s11 = sshll.u32 %s2122_s29, 7  ;;  %s1162_s12 = sshll.u32 %s2122_s29, 3 }
  0x83   : > { %s2126_s30 = scalar_lea.vmem [#allocation9], %s1161_s11  ;;  %s2128_s14 = scalar_lea.vmem [#allocation10], %s1162_s12 }
  0x84   : > { %p1163_p3 = scmp.ne.s32.totalorder %s2406_s5, 0 }
  0x86   : > { %304 = sbr.rel (%p1163_p3) target bundleno = 148 (0x94), region = 48 }
  0x8b   : > { %v1867_v0 = vmov 0.0  }
  0x8c   : > { %305 = vst [vmem:[#allocation2 + $0x30] sm:$0xff] %v1867_v0  ;;  %306 = vst [vmem:[#allocation2] sm:$0xff] %v1867_v0 }
  0x8d   : > { %307 = vst [vmem:[#allocation2 + $0x58] sm:$0xff] %v1867_v0  ;;  %308 = vst [vmem:[#allocation2 + $0x18] sm:$0xff] %v1867_v0 }
  0x8e   : > { %309 = vst [vmem:[#allocation2 + $0x50] sm:$0xff] %v1867_v0  ;;  %310 = vst [vmem:[#allocation2 + $0x68] sm:$0xff] %v1867_v0 }
  0x8f   : > { %311 = vst [vmem:[#allocation2 + $0x8] sm:$0xff] %v1867_v0  ;;  %312 = vst [vmem:[#allocation2 + $0x48] sm:$0xff] %v1867_v0 }
  0x90   : > { %313 = vst [vmem:[#allocation2 + $0x40] sm:$0xff] %v1867_v0  ;;  %314 = vst [vmem:[#allocation2 + $0x20] sm:$0xff] %v1867_v0 }
  0x91   : > { %315 = vst [vmem:[#allocation2 + $0x10] sm:$0xff] %v1867_v0  ;;  %316 = vst [vmem:[#allocation2 + $0x38] sm:$0xff] %v1867_v0 }
  0x92   : > { %317 = vst [vmem:[#allocation2 + $0x60] sm:$0xff] %v1867_v0  ;;  %318 = vst [vmem:[#allocation2 + $0x70] sm:$0xff] %v1867_v0 }
  0x93   : > { %319 = vst [vmem:[#allocation2 + $0x78] sm:$0xff] %v1867_v0  ;;  %320 = vst [vmem:[#allocation2 + $0x28] sm:$0xff] %v1867_v0 }
  0x94 PF: > { %v1571_v1 = vld [vmem:[%s2111_s16 + $0x38] sm:$0xff]   ;;  %v1572_v2 = vld [vmem:[%s2111_s16 + $0x30] sm:$0xff]   ;;  %v1573_v3 = vld [vmem:[%s2111_s16 + $0x28] sm:$0xff]   ;;  %s2407_s2 = sld [smem:[#allocation19_spill]] }
  0x95   : > { %1265 = vmatprep.subr.bf16.mxu0 %v1571_v1  ;;  %1399 = vmatprep.subr.bf16.mxu1 %v1571_v1  ;;  %v1574_v4 = vld [vmem:[%s2111_s16 + $0x20] sm:$0xff]   ;;  %v1575_v7 = vld [vmem:[%s2111_s16 + $0x18] sm:$0xff]   ;;  %v1576_v8 = vld [vmem:[%s2111_s16 + $0x10] sm:$0xff]  }
  0x96   : > { %1266 = vmatpush3.bf16.msra.mxu0 %v1571_v1  ;;  %1407 = vmatpush3.bf16.msra.mxu1 %v1571_v1  ;;  %v1579_v5 = vld [vmem:[%s2103_s24] sm:$0xff]   ;;  %v1577_v9 = vld [vmem:[%s2111_s16 + $0x8] sm:$0xff]   ;;  %v1583_v13 = vld [vmem:[%s2103_s24 + $0x10] sm:$0xff]  }
  0x97   : > { %1267 = vmatprep.subr.bf16.mxu0 %v1572_v2  ;;  %1400 = vmatprep.subr.bf16.mxu1 %v1572_v2  ;;  %v1580_v6 = vld [vmem:[%s2103_s24 + $0x20] sm:$0xff]   ;;  %v1581_v11 = vld [vmem:[%s2103_s24 + $0x8] sm:$0xff]   ;;  %v1584_v14 = vld [vmem:[%s2103_s24 + $0x30] sm:$0xff]  }
  0x98   : > { %1281 = vmatprep.mubr.bf16.mxu0 %v1579_v5  ;;  %1289 = vmatprep.mubr.bf16.mxu1 %v1580_v6  ;;  %v1578_v10 = vld [vmem:[%s2111_s16] sm:$0xff]   ;;  %v1582_v12 = vld [vmem:[%s2103_s24 + $0x28] sm:$0xff]   ;;  %v1585_v15 = vld [vmem:[%s2103_s24 + $0x18] sm:$0xff]  }
  0x99   : > { %v1586_v16 = vld [vmem:[%s2103_s24 + $0x38] sm:$0xff]   ;;  %v331_v18 = vld [vmem:[#allocation2 + $0x10] sm:$0xff]  ;;  %v329_v22 = vld [vmem:[#allocation2 + $0x40] sm:$0xff] }
  0x9a   : > { %1268 = vmatpush3.bf16.msra.mxu0 %v1572_v2  ;;  %1408 = vmatpush3.bf16.msra.mxu1 %v1572_v2  ;;  %v323_v17 = vld [vmem:[#allocation2 + $0x58] sm:$0xff]  ;;  %v321_v21 = vld [vmem:[#allocation2 + $0x30] sm:$0xff]  ;;  %v322_v33 = vld [vmem:[#allocation2] sm:$0xff]  ;;  %p1180_p1 = scmp.ne.s32.totalorder %s2407_s2, 1 }
  0x9b   : > { %1269 = vmatprep.subr.bf16.mxu0 %v1573_v3  ;;  %1401 = vmatprep.subr.bf16.mxu1 %v1573_v3  ;;  %v324_v27 = vld [vmem:[#allocation2 + $0x18] sm:$0xff]  ;;  %v330_v34 = vld [vmem:[#allocation2 + $0x20] sm:$0xff]  ;;  %v327_v39 = vld [vmem:[#allocation2 + $0x8] sm:$0xff] }
  0x9c   : > { %v332_v28 = vld [vmem:[#allocation2 + $0x38] sm:$0xff]  ;;  %v325_v45 = vld [vmem:[#allocation2 + $0x50] sm:$0xff]  ;;  %v333_v46 = vld [vmem:[#allocation2 + $0x60] sm:$0xff] }
  0x9d   : > { %v335_v40 = vld [vmem:[#allocation2 + $0x78] sm:$0xff]  ;;  %v328_v51 = vld [vmem:[#allocation2 + $0x48] sm:$0xff]  ;;  %v334_v58 = vld [vmem:[#allocation2 + $0x70] sm:$0xff] }
  0x9e   : > { %1270 = vmatpush3.bf16.msra.mxu0 %v1573_v3  ;;  %1409 = vmatpush3.bf16.msra.mxu1 %v1573_v3  ;;  %v336_v52 = vld [vmem:[#allocation2 + $0x28] sm:$0xff] }
  0x9f   : > { %1271 = vmatprep.subr.bf16.mxu0 %v1574_v4  ;;  %1402 = vmatprep.subr.bf16.mxu1 %v1574_v4  ;;  %v326_v57 = vld [vmem:[#allocation2 + $0x68] sm:$0xff] }
  0xa2   : > { %1272 = vmatpush3.bf16.msra.mxu0 %v1574_v4  ;;  %1410 = vmatpush3.bf16.msra.mxu1 %v1574_v4 }
  0xa3   : > { %1273 = vmatprep.subr.bf16.mxu0 %v1575_v7  ;;  %1403 = vmatprep.subr.bf16.mxu1 %v1575_v7 }
  0xa6   : > { %1274 = vmatpush3.bf16.msra.mxu0 %v1575_v7  ;;  %1411 = vmatpush3.bf16.msra.mxu1 %v1575_v7 }
  0xa7   : > { %1275 = vmatprep.subr.bf16.mxu0 %v1576_v8  ;;  %1404 = vmatprep.subr.bf16.mxu1 %v1576_v8 }
  0xaa   : > { %1276 = vmatpush3.bf16.msra.mxu0 %v1576_v8  ;;  %1412 = vmatpush3.bf16.msra.mxu1 %v1576_v8 }
  0xab   : > { %1277 = vmatprep.subr.bf16.mxu0 %v1577_v9  ;;  %1405 = vmatprep.subr.bf16.mxu1 %v1577_v9 }
  0xae   : > { %1278 = vmatpush3.bf16.msra.mxu0 %v1577_v9  ;;  %1413 = vmatpush3.bf16.msra.mxu1 %v1577_v9 }
  0xaf   : > { %1279 = vmatprep.subr.bf16.mxu0 %v1578_v10  ;;  %1406 = vmatprep.subr.bf16.mxu1 %v1578_v10 }
  0xb2   : > { %1280 = vmatpush3.bf16.msra.mxu0 %v1578_v10  ;;  %1414 = vmatpush3.bf16.msra.mxu1 %v1578_v10 }
  0xb5   : > { %1282 = vmatmul.mubr.bf16.vlgmr.msra.gmra.mxu0 %v1581_v11  ;;  %1290 = vmatmul.mubr.bf16.vlgmr.msra.gmra.mxu1 %v1582_v12 }
  0xb6   : > { %1285 = vmatprep.mubr.bf16.mxu0 %v1583_v13  ;;  %1293 = vmatprep.mubr.bf16.mxu1 %v1584_v14 }
  0xbd   : > { %1286 = vmatmul.mubr.bf16.gmra.mxu0 %v1585_v15  ;;  %1294 = vmatmul.mubr.bf16.gmra.mxu1 %v1586_v16 }
 0x175   : > { %v1283_v19 = vpop.f32.mrf.mxu0  ;;  %v1291_v20 = vpop.f32.mrf.mxu1 }
 0x176   : > { %v564_v23 = vadd.f32 %v1283_v19, %v323_v17  ;;  %v572_v24 = vadd.f32 %v1291_v20, %v331_v18 }
 0x177   : > { %v499_v25 = vpop.f32.mrf.mxu0  ;;  %v531_v26 = vpop.f32.mrf.mxu1 }
 0x178   : > { %580 = vst [vmem:[#allocation2 + $0x58] sm:$0xff] %v564_v23  ;;  %588 = vst [vmem:[#allocation2 + $0x10] sm:$0xff] %v572_v24  ;;  %v562_v29 = vadd.f32 %v499_v25, %v321_v21  ;;  %v570_v30 = vadd.f32 %v531_v26, %v329_v22 }
 0x179   : > { %v1284_v31 = vpop.f32.mrf.mxu0  ;;  %v1292_v32 = vpop.f32.mrf.mxu1 }
 0x17a   : > { %578 = vst [vmem:[#allocation2 + $0x30] sm:$0xff] %v562_v29  ;;  %586 = vst [vmem:[#allocation2 + $0x40] sm:$0xff] %v570_v30  ;;  %v565_v35 = vadd.f32 %v1284_v31, %v324_v27  ;;  %v573_v36 = vadd.f32 %v1292_v32, %v332_v28 }
 0x17b   : > { %v502_v37 = vpop.f32.mrf.mxu0  ;;  %v534_v38 = vpop.f32.mrf.mxu1 }
 0x17c   : > { %581 = vst [vmem:[#allocation2 + $0x18] sm:$0xff] %v565_v35  ;;  %589 = vst [vmem:[#allocation2 + $0x38] sm:$0xff] %v573_v36  ;;  %v563_v41 = vadd.f32 %v502_v37, %v322_v33  ;;  %v571_v42 = vadd.f32 %v534_v38, %v330_v34 }
 0x17d   : > { %v1287_v43 = vpop.f32.mrf.mxu0  ;;  %v1295_v44 = vpop.f32.mrf.mxu1 }
 0x17e   : > { %579 = vst [vmem:[#allocation2] sm:$0xff] %v563_v41  ;;  %587 = vst [vmem:[#allocation2 + $0x20] sm:$0xff] %v571_v42  ;;  %v568_v47 = vadd.f32 %v1287_v43, %v327_v39  ;;  %v576_v48 = vadd.f32 %v1295_v44, %v335_v40 }
 0x17f   : > { %v515_v49 = vpop.f32.mrf.mxu0  ;;  %v547_v50 = vpop.f32.mrf.mxu1 }
 0x180   : > { %584 = vst [vmem:[#allocation2 + $0x8] sm:$0xff] %v568_v47  ;;  %592 = vst [vmem:[#allocation2 + $0x78] sm:$0xff] %v576_v48  ;;  %v566_v53 = vadd.f32 %v515_v49, %v325_v45  ;;  %v574_v54 = vadd.f32 %v547_v50, %v333_v46 }
 0x181   : > { %v1288_v55 = vpop.f32.mrf.mxu0  ;;  %v1296_v56 = vpop.f32.mrf.mxu1 }
 0x182   : > { %582 = vst [vmem:[#allocation2 + $0x50] sm:$0xff] %v566_v53  ;;  %590 = vst [vmem:[#allocation2 + $0x60] sm:$0xff] %v574_v54  ;;  %v569_v59 = vadd.f32 %v1288_v55, %v328_v51  ;;  %v577_v60 = vadd.f32 %v1296_v56, %v336_v52  ;;  %597 = sbr.rel (%p1180_p1) target bundleno = 876 (0x36c), region = 52 }
 0x183   : > { %v518_v61 = vpop.f32.mrf.mxu0  ;;  %v550_v62 = vpop.f32.mrf.mxu1 }
 0x184   : > { %585 = vst [vmem:[#allocation2 + $0x48] sm:$0xff] %v569_v59  ;;  %593 = vst [vmem:[#allocation2 + $0x28] sm:$0xff] %v577_v60  ;;  %v567_v63 = vadd.f32 %v518_v61, %v326_v57  ;;  %v575_v0 = vadd.f32 %v550_v62, %v334_v58 }
 0x186   : > { %583 = vst [vmem:[#allocation2 + $0x68] sm:$0xff] %v567_v63  ;;  %591 = vst [vmem:[#allocation2 + $0x70] sm:$0xff] %v575_v0 }
 0x187   : > { %v1587_v1 = vld [vmem:[#allocation8 + $0x38] sm:$0xff]   ;;  %v1588_v2 = vld [vmem:[#allocation8 + $0x30] sm:$0xff]   ;;  %v1589_v3 = vld [vmem:[#allocation8 + $0x28] sm:$0xff]   ;;  %v1868_v33 = vmov 0.0   ;;  %vm1869_vm0 = vmmov 0   ;;  %vm958_vm1 = vcmask 1040384  }
 0x188   : > { %1297 = vmatprep.subr.bf16.mxu0 %v1587_v1  ;;  %v1590_v4 = vld [vmem:[#allocation8 + $0x20] sm:$0xff]   ;;  %v598_v5 = vld [vmem:[#allocation2 + $0x30] sm:$0xff]  ;;  %v1591_v8 = vld [vmem:[#allocation8 + $0x18] sm:$0xff]   ;;  %1329 = vmatprep.subr.mxu1 %v1868_v33  ;;  %vm960_vm2 = vcmask 1041408  }
 0x189   : > { %1298 = vmatpush3.bf16.msra.mxu0 %v1587_v1  ;;  %v599_v6 = vld [vmem:[#allocation2] sm:$0xff]  ;;  %v1592_v9 = vld [vmem:[#allocation8 + $0x10] sm:$0xff]   ;;  %v1593_v10 = vld [vmem:[#allocation8 + $0x8] sm:$0xff]   ;;  %1361 = vmatprep.mubr.msk.f32.mxu1 %vm1869_vm0, %v1868_v33 }
 0x18a   : > { %1299 = vmatprep.subr.bf16.mxu0 %v1588_v2  ;;  %v614_v7 = vpack.c.bf16 %v599_v6, %v598_v5  ;;  %v1594_v11 = vld [vmem:[#allocation8] sm:$0xff]   ;;  %v600_v12 = vld [vmem:[#allocation2 + $0x58] sm:$0xff]  ;;  %v602_v14 = vld [vmem:[#allocation2 + $0x50] sm:$0xff] }
 0x18b   : > { %v601_v13 = vld [vmem:[#allocation2 + $0x18] sm:$0xff]  ;;  %v604_v18 = vld [vmem:[#allocation2 + $0x8] sm:$0xff]  ;;  %v606_v20 = vld [vmem:[#allocation2 + $0x40] sm:$0xff] }
 0x18c   : > { %1313 = vmatprep.mubr.bf16.mxu0 %v614_v7  ;;  %v615_v16 = vpack.c.bf16 %v601_v13, %v600_v12  ;;  %v605_v19 = vld [vmem:[#allocation2 + $0x48] sm:$0xff]  ;;  %v607_v21 = vld [vmem:[#allocation2 + $0x20] sm:$0xff]  ;;  %v608_v24 = vld [vmem:[#allocation2 + $0x10] sm:$0xff] }
 0x18d   : > { %1300 = vmatpush3.bf16.msra.mxu0 %v1588_v2  ;;  %v603_v15 = vld [vmem:[#allocation2 + $0x68] sm:$0xff]  ;;  %v617_v22 = vpack.c.bf16 %v605_v19, %v604_v18  ;;  %v618_v23 = vpack.c.bf16 %v607_v21, %v606_v20  ;;  %v609_v25 = vld [vmem:[#allocation2 + $0x38] sm:$0xff]  ;;  %v610_v26 = vld [vmem:[#allocation2 + $0x60] sm:$0xff]  ;;  %v1870_v2 = vmov 1.0  }
 0x18e   : > { %1301 = vmatprep.subr.bf16.mxu0 %v1589_v3  ;;  %v616_v17 = vpack.c.bf16 %v603_v15, %v602_v14  ;;  %v611_v27 = vld [vmem:[#allocation2 + $0x70] sm:$0xff]  ;;  %v619_v28 = vpack.c.bf16 %v609_v25, %v608_v24  ;;  %v612_v30 = vld [vmem:[#allocation2 + $0x78] sm:$0xff]  ;;  %v613_v31 = vld [vmem:[#allocation2 + $0x28] sm:$0xff] }
 0x18f   : > { %v620_v29 = vpack.c.bf16 %v611_v27, %v610_v26  ;;  %v621_v32 = vpack.c.bf16 %v613_v31, %v612_v30 }
 0x191   : > { %1302 = vmatpush3.bf16.msra.mxu0 %v1589_v3 }
 0x192   : > { %1303 = vmatprep.subr.bf16.mxu0 %v1590_v4 }
 0x195   : > { %1304 = vmatpush3.bf16.msra.mxu0 %v1590_v4 }
 0x196   : > { %1305 = vmatprep.subr.bf16.mxu0 %v1591_v8 }
 0x199   : > { %1306 = vmatpush3.bf16.msra.mxu0 %v1591_v8 }
 0x19a   : > { %1307 = vmatprep.subr.bf16.mxu0 %v1592_v9 }
 0x19d   : > { %1308 = vmatpush3.bf16.msra.mxu0 %v1592_v9 }
 0x19e   : > { %1309 = vmatprep.subr.bf16.mxu0 %v1593_v10 }
 0x1a1   : > { %1310 = vmatpush3.bf16.msra.mxu0 %v1593_v10 }
 0x1a2   : > { %1311 = vmatprep.subr.bf16.mxu0 %v1594_v11 }
 0x1a5   : > { %1312 = vmatpush3.bf16.msra.mxu0 %v1594_v11 }
 0x1a6   : > { %1364 = vmatprep.subr.mxu0 %v1868_v33 }
 0x1a8   : > { %1314 = vmatmul.mubr.bf16.vlgmr.msra.gmra.mxu0 %v615_v16 }
 0x1a9   : > { %1317 = vmatprep.mubr.bf16.mxu0 %v616_v17 }
 0x1b0   : > { %1318 = vmatmul.mubr.bf16.gmra.mxu0 %v617_v22 }
 0x1b1   : > { %1321 = vmatprep.mubr.bf16.mxu0 %v618_v23 }
 0x1b8   : > { %1322 = vmatmul.mubr.bf16.gmra.mxu0 %v619_v28 }
 0x1b9   : > { %1325 = vmatprep.mubr.bf16.mxu0 %v620_v29 }
 0x1c0   : > { %1326 = vmatmul.mubr.bf16.gmra.mxu0 %v621_v32 }
 0x1c1   : > { %1396 = vmatprep.mubr.msk.f32.mxu0 %vm1869_vm0, %v1868_v33 }
 0x268   : > { %v2152_v34 = vpop.f32.mrf.mxu0 }
 0x269   : > { %785 = vst [vmem:[%s2126_s30 + $0x10] sm:$0xff] %v2152_v34  ;;  %v871_v63 = vmul.f32 %v2152_v34, %v2152_v34 }
 0x26a   : > { %v2156_v35 = vpop.f32.mrf.mxu0 }
 0x26b   : > { %783 = vst [vmem:[%s2126_s30] sm:$0xff] %v2156_v35  ;;  %v869_v1 = vmul.f32 %v2156_v35, %v2156_v35 }
 0x26c   : > { %v2160_v36 = vpop.f32.mrf.mxu0 }
 0x26d   : > { %786 = vst [vmem:[%s2126_s30 + $0x18] sm:$0xff] %v2160_v36  ;;  %v872_v62 = vmul.f32 %v2160_v36, %v2160_v36 }
 0x26e   : > { %v2164_v37 = vpop.f32.mrf.mxu0 }
 0x26f   : > { %784 = vst [vmem:[%s2126_s30 + $0x8] sm:$0xff] %v2164_v37  ;;  %v870_v0 = vmul.f32 %v2164_v37, %v2164_v37 }
 0x270   : > { %v2168_v38 = vpop.f32.mrf.mxu0 }
 0x271   : > { %789 = vst [vmem:[%s2126_s30 + $0x30] sm:$0xff] %v2168_v38  ;;  %v875_v59 = vmul.f32 %v2168_v38, %v2168_v38 }
 0x272   : > { %v2172_v39 = vpop.f32.mrf.mxu0 }
 0x273   : > { %787 = vst [vmem:[%s2126_s30 + $0x20] sm:$0xff] %v2172_v39  ;;  %v873_v61 = vmul.f32 %v2172_v39, %v2172_v39 }
 0x274   : > { %v1320_v40 = vpop.f32.mrf.mxu0 }
 0x275   : > { %790 = vst [vmem:[%s2126_s30 + $0x38] sm:$0xff] %v1320_v40  ;;  %v876_v58 = vmul.f32 %v1320_v40, %v1320_v40 }
 0x276   : > { %v2177_v41 = vpop.f32.mrf.mxu0 }
 0x277   : > { %788 = vst [vmem:[%s2126_s30 + $0x28] sm:$0xff] %v2177_v41  ;;  %v874_v60 = vmul.f32 %v2177_v41, %v2177_v41 }
 0x278   : > { %v1323_v42 = vpop.f32.mrf.mxu0 }
 0x279   : > { %793 = vst [vmem:[%s2126_s30 + $0x50] sm:$0xff] %v1323_v42  ;;  %v879_v55 = vmul.f32 %v1323_v42, %v1323_v42 }
 0x27a   : > { %v752_v43 = vpop.f32.mrf.mxu0 }
 0x27b   : > { %791 = vst [vmem:[%s2126_s30 + $0x40] sm:$0xff] %v752_v43  ;;  %v877_v57 = vmul.f32 %v752_v43, %v752_v43 }
 0x27c   : > { %v1324_v44 = vpop.f32.mrf.mxu0 }
 0x27d   : > { %794 = vst [vmem:[%s2126_s30 + $0x58] sm:$0xff] %v1324_v44  ;;  %v880_v54 = vmul.f32 %v1324_v44, %v1324_v44 }
 0x27e   : > { %v755_v45 = vpop.f32.mrf.mxu0 }
 0x27f   : > { %792 = vst [vmem:[%s2126_s30 + $0x48] sm:$0xff] %v755_v45  ;;  %v878_v56 = vmul.f32 %v755_v45, %v755_v45 }
 0x280   : > { %v1327_v46 = vpop.f32.mrf.mxu0 }
 0x281   : > { %797 = vst [vmem:[%s2126_s30 + $0x70] sm:$0xff] %v1327_v46  ;;  %v883_v51 = vmul.f32 %v1327_v46, %v1327_v46 }
 0x282   : > { %v768_v47 = vpop.f32.mrf.mxu0 }
 0x283   : > { %795 = vst [vmem:[%s2126_s30 + $0x60] sm:$0xff] %v768_v47  ;;  %v881_v53 = vmul.f32 %v768_v47, %v768_v47 }
 0x284   : > { %v1328_v48 = vpop.f32.mrf.mxu0 }
 0x285   : > { %798 = vst [vmem:[%s2126_s30 + $0x78] sm:$0xff] %v1328_v48  ;;  %v884_v49 = vmul.f32 %v1328_v48, %v1328_v48  ;;  %1330 = vmatpush3.msra.mxu1 %v1328_v48 }
 0x286   : > { %v771_v50 = vpop.f32.mrf.mxu0  ;;  %1331 = vmatprep.subr.mxu1 %v1868_v33 }
 0x287   : > { %796 = vst [vmem:[%s2126_s30 + $0x68] sm:$0xff] %v771_v50  ;;  %1332 = vmatpush3.msra.mxu1 %v1327_v46  ;;  %1365 = vmatpush3.msra.mxu0 %v884_v49  ;;  %v882_v52 = vmul.f32 %v771_v50, %v771_v50 }
 0x288   : > { %1333 = vmatprep.subr.mxu1 %v1868_v33  ;;  %1366 = vmatprep.subr.mxu0 %v1868_v33 }
 0x289   : > { %1334 = vmatpush3.msra.mxu1 %v771_v50  ;;  %1367 = vmatpush3.msra.mxu0 %v883_v51 }
 0x28a   : > { %1335 = vmatprep.subr.mxu1 %v1868_v33  ;;  %1368 = vmatprep.subr.mxu0 %v1868_v33 }
 0x28b   : > { %1336 = vmatpush3.msra.mxu1 %v768_v47  ;;  %1369 = vmatpush3.msra.mxu0 %v882_v52 }
 0x28c   : > { %1337 = vmatprep.subr.mxu1 %v1868_v33  ;;  %1370 = vmatprep.subr.mxu0 %v1868_v33 }
 0x28d   : > { %1338 = vmatpush3.msra.mxu1 %v1324_v44  ;;  %1371 = vmatpush3.msra.mxu0 %v881_v53 }
 0x28e   : > { %1339 = vmatprep.subr.mxu1 %v1868_v33  ;;  %1372 = vmatprep.subr.mxu0 %v1868_v33 }
 0x28f   : > { %1340 = vmatpush3.msra.mxu1 %v1323_v42  ;;  %1373 = vmatpush3.msra.mxu0 %v880_v54 }
 0x290   : > { %1341 = vmatprep.subr.mxu1 %v1868_v33  ;;  %1374 = vmatprep.subr.mxu0 %v1868_v33 }
 0x291   : > { %1342 = vmatpush3.msra.mxu1 %v755_v45  ;;  %1375 = vmatpush3.msra.mxu0 %v879_v55 }
 0x292   : > { %1343 = vmatprep.subr.mxu1 %v1868_v33  ;;  %1376 = vmatprep.subr.mxu0 %v1868_v33 }
 0x293   : > { %1344 = vmatpush3.msra.mxu1 %v752_v43  ;;  %1377 = vmatpush3.msra.mxu0 %v878_v56 }
 0x294   : > { %1345 = vmatprep.subr.mxu1 %v1868_v33  ;;  %1378 = vmatprep.subr.mxu0 %v1868_v33 }
 0x295   : > { %1346 = vmatpush3.msra.mxu1 %v1320_v40  ;;  %1379 = vmatpush3.msra.mxu0 %v877_v57 }
 0x296   : > { %1347 = vmatprep.subr.mxu1 %v1868_v33  ;;  %1380 = vmatprep.subr.mxu0 %v1868_v33 }
 0x297   : > { %1348 = vmatpush3.msra.mxu1 %v2168_v38  ;;  %1381 = vmatpush3.msra.mxu0 %v876_v58 }
 0x298   : > { %1349 = vmatprep.subr.mxu1 %v1868_v33  ;;  %1382 = vmatprep.subr.mxu0 %v1868_v33 }
 0x299   : > { %1350 = vmatpush3.msra.mxu1 %v2177_v41  ;;  %1383 = vmatpush3.msra.mxu0 %v875_v59 }
 0x29a   : > { %1351 = vmatprep.subr.mxu1 %v1868_v33  ;;  %1384 = vmatprep.subr.mxu0 %v1868_v33 }
 0x29b   : > { %1352 = vmatpush3.msra.mxu1 %v2172_v39  ;;  %1385 = vmatpush3.msra.mxu0 %v874_v60 }
 0x29c   : > { %1353 = vmatprep.subr.mxu1 %v1868_v33  ;;  %1386 = vmatprep.subr.mxu0 %v1868_v33 }
 0x29d   : > { %1354 = vmatpush3.msra.mxu1 %v2160_v36  ;;  %1387 = vmatpush3.msra.mxu0 %v873_v61 }
 0x29e   : > { %1355 = vmatprep.subr.mxu1 %v1868_v33  ;;  %1388 = vmatprep.subr.mxu0 %v1868_v33 }
 0x29f   : > { %1356 = vmatpush3.msra.mxu1 %v2152_v34  ;;  %1389 = vmatpush3.msra.mxu0 %v872_v62 }
 0x2a0   : > { %1357 = vmatprep.subr.mxu1 %v1868_v33  ;;  %1390 = vmatprep.subr.mxu0 %v1868_v33 }
 0x2a1   : > { %1358 = vmatpush3.msra.mxu1 %v2164_v37  ;;  %1391 = vmatpush3.msra.mxu0 %v871_v63 }
 0x2a2   : > { %1359 = vmatprep.subr.mxu1 %v1868_v33  ;;  %1392 = vmatprep.subr.mxu0 %v1868_v33 }
 0x2a3   : > { %1360 = vmatpush3.msra.mxu1 %v2156_v35  ;;  %1393 = vmatpush3.msra.mxu0 %v870_v0 }
 0x2a4   : > { %1394 = vmatprep.subr.mxu0 %v1868_v33  ;;  %1362 = vmatmul.mubr.f32.vlgmr.msra.gmra.mxu1 %v1870_v2 }
 0x2a5   : > { %1395 = vmatpush3.msra.mxu0 %v869_v1 }
 0x2a6   : > { %1397 = vmatmul.mubr.f32.vlgmr.msra.gmra.mxu0 %v1870_v2 }
 0x364   : > { %v865_v3 = vpop.f32.mrf.mxu1 }
 0x366   : > { %v951_v4 = vpop.f32.mrf.mxu0  ;;  %v1363_v5 = vpop.f32.mrf.mxu1 }
 0x367   : > { %v956_v6 = vrot.slane %v951_v4, 7 }
 0x368   : > { %v1398_v7 = vpop.f32.mrf.mxu0 }
 0x369   : > { %v959_v8 = vsel %vm958_vm1, %v865_v3, %v956_v6 }
 0x36a   : > { %v961_v9 = vsel %vm960_vm2, %v959_v8, 0.0 }
 0x36b   : > { %962 = vst [vmem:[%s2128_s14] sm:$0xff] %v961_v9 }
 0x36c PF: > { %s2408_s3 = sld [smem:[#allocation20_spill]]  ;;  %s982_s10 = sshll.u32 %s2126_s30, 4  ;;  %s2248_s10 = int_to_ptr.vmem [resolvable:$true] %s982_s10 }
 0x36d   : > { %s2409_s24 = sld [smem:[#allocation23_spill]]  ;;  %s964_s16 = scalar_lea.sflag [#allocation5], %s2122_s29 }
 0x36e   : > { %s2410_s7 = sld [smem:[#allocation30_spill]]  ;;  %s1677_s6 = scalar_lea.vmem %s2248_s10, 2048 }
 0x36f   : > { %p1678_p5 = scmp.ne.s32.totalorder %s2248_s10, %s1677_s6  ;;  %s1871_s11 = smov [#allocation9]  }
 0x370   : > { %s1681_s12 = sshll.u32 %s1871_s11, 4  ;;  %s1682_s12 = int_to_ptr.vmem [resolvable:$false] %s1681_s12 }
 0x371   : > { %s1683_s5 = scalar_lea.vmem %s1682_s12, 4096  ;;  %p1684_p9 = scmp.lt.s32.totalorder %s2248_s10, %s1682_s12 }
 0x372   : > { %s1198_s18 = sshll.u32 %s2408_s3, 11  ;;  %p1685_p4 = scmp.lt.s32.totalorder %s1683_s5, %s1677_s6 }
 0x373   : > { %p2411_p11 = scmp.ne.s32.totalorder %s2409_s24, 0 }
 0x374   : > { %s2245_s8 = scalar_lea.hbm %s2410_s7, %s1198_s18  ;;  %p1686_p12 = por %p1685_p4, %p1684_p9 }
 0x375   : > { %p1679_p0 = pnand %p1678_p5, %p2411_p11 }
 0x377   : > { %p1680_p8 = pneg %p1679_p0 }
 0x379   : > { %p1687_p6 = pnand %p1686_p12, %p1680_p8 }
 0x37b   : > { %1690 = shalt.err (!%p1687_p6)
}
 0x37c   : > { %s1691_s30 = scalar_lea.hbm %s2245_s8, 2048  ;;  %s1695_s9 = scalar_lea.hbm %s2410_s7, 4096 }
 0x37d   : > { %p1692_p7 = scmp.ne.s32.totalorder %s2245_s8, %s1691_s30  ;;  %p1696_p10 = scmp.lt.s32.totalorder %s2245_s8, %s2410_s7 }
 0x37e   : > { %p1697_p3 = scmp.lt.s32.totalorder %s1695_s9, %s1691_s30 }
 0x37f   : > { %p1693_p13 = pnand %p1692_p7, %p2411_p11 }
 0x380   : > { %p1698_p1 = por %p1697_p3, %p1696_p10 }
 0x381   : > { %p1694_p2 = pneg %p1693_p13 }
 0x383   : > { %p1699_p5 = pnand %p1698_p1, %p1694_p2 }
 0x385   : > { %1702 = shalt.err (!%p1699_p5)
}
 0x386   : > { %s1872_s6 = smov 128   ;;  %s1873_s12 = smov 8  }
 0x387   : > { %1423 = dma.vmem_to_hbm [thread:$0]  (%p2411_p11), %s2248_s10, 2048, %s2245_s8, %s964_s16, %s1872_s6, %s1872_s6, %s1873_s12  }
 0x388   : > { %s1193_s5 = sshll.u32 %s2408_s3, 7  ;;  %s998_s2 = sshll.u32 %s2128_s14, 4  ;;  %s999_s2 = int_to_ptr.vmem [resolvable:$true] %s998_s2 }
 0x389   : > { %s2412_s9 = sld [smem:[#allocation31_spill]]  ;;  %s969_s11 = scalar_lea.sflag [#allocation11], %s2122_s29 }
 0x38a   : > { %s1703_s0 = scalar_lea.vmem %s999_s2, 128  ;;  %s1874_s1 = smov [#allocation10]  }
 0x38b   : > { %p1704_p0 = scmp.ne.s32.totalorder %s999_s2, %s1703_s0  ;;  %s1707_s7 = sshll.u32 %s1874_s1, 4  ;;  %s1708_s7 = int_to_ptr.vmem [resolvable:$false] %s1707_s7 }
 0x38c   : > { %s1709_s13 = scalar_lea.vmem %s1708_s7, 256  ;;  %p1710_p4 = scmp.lt.s32.totalorder %s999_s2, %s1708_s7 }
 0x38d   : > { %p1705_p8 = pnand %p1704_p0, %p2411_p11  ;;  %p1711_p12 = scmp.lt.s32.totalorder %s1709_s13, %s1703_s0 }
 0x38f   : > { %s996_s25 = scalar_lea.hbm %s2412_s9, %s1193_s5  ;;  %p1706_p9 = pneg %p1705_p8 }
 0x390   : > { %p1712_p6 = por %p1711_p12, %p1710_p4 }
 0x392   : > { %p1713_p7 = pnand %p1712_p6, %p1706_p9 }
 0x394   : > { %1716 = shalt.err (!%p1713_p7)
}
 0x395   : > { %s1717_s14 = scalar_lea.hbm %s996_s25, 128  ;;  %s1721_s8 = scalar_lea.hbm %s2412_s9, 256 }
 0x396   : > { %p1718_p13 = scmp.ne.s32.totalorder %s996_s25, %s1717_s14  ;;  %p1722_p3 = scmp.lt.s32.totalorder %s996_s25, %s2412_s9 }
 0x397   : > { %p1723_p1 = scmp.lt.s32.totalorder %s1721_s8, %s1717_s14 }
 0x398   : > { %p1719_p2 = pnand %p1718_p13, %p2411_p11 }
 0x399   : > { %p1724_p5 = por %p1723_p1, %p1722_p3 }
 0x39a   : > { %p1720_p10 = pneg %p1719_p2 }
 0x39c   : > { %p1725_p0 = pnand %p1724_p5, %p1720_p10 }
 0x39e   : > { %1728 = shalt.err (!%p1725_p0)
}
 0x39f   : > { %1424 = dma.vmem_to_hbm [thread:$0]  (%p2411_p11), %s999_s2, 128, %s996_s25, %s969_s11  }
 0x3a0 PF: > { %s2413_s0 = sld [smem:[#allocation17_spill]]  ;;  %p1448_p8 = scmp.ge.s32.totalorder %s1859_s28, 2 }
 0x3a1   : > { %s2414_s1 = sld [smem:[#allocation24_spill]] }
 0x3a6   : > { %s1010_s13 = sand.u32 1, %s2413_s0  }
 0x3a7   : > { %p2415_p9 = scmp.ne.s32.totalorder %s2414_s1, 0  ;;  %s1011_s7 = scalar_lea.sflag [#allocation5], %s1010_s13 }
 0x3a9   : > { %p1439_p4 = pnand %p1448_p8, %p2415_p9 }
 0x3ab   : > { %p1440_p12 = pneg %p1439_p4 }
 0x3ad   : > { %1798 = dma.done.wait (%p1440_p12), %s1011_s7, 2048  }
 0x3ae   : > { %1800 = vsyncadd (%p1440_p12), %s1011_s7, 4294965248  ;;  %s1020_s6 = scalar_lea.sflag [#allocation11], %s1010_s13 }
 0x3af   : > { %1802 = dma.done.wait (%p1440_p12), %s1020_s6, 128  }
 0x3b0   : > { %1804 = vsyncadd (%p1440_p12), %s1020_s6, 4294967168  ;;  %s27_s28 = sadd.s32 1, %s1859_s28   ;;  %s2417_s12 = sld [smem:[#allocation18_spill]] }
 0x3b1   : > { %p2296_p6 = scmp.ge.s32.totalorder %s27_s28, 6   ;;  %s2418_s5 = smov %s2046_s15 }
 0x3b2   : > { %s2419_s2 = sld [smem:[#allocation25_spill]]  ;;  %s2423_s16 = smov %s1815_s17 }
 0x3b3   : > { %s2420_s30 = sld [smem:[#allocation26_spill]]  ;;  %s2424_s17 = smov %s2418_s5 }
 0x3b4   : > { %s2425_s18 = smov %s1823_s19  ;;  %s2426_s19 = smov %s1827_s20 }
 0x3b5   : > { %s2427_s20 = smov %s2076_s21  ;;  %s2428_s21 = smov %s1835_s22 }
 0x3b6   : > { %s2422_s15 = smov %s2417_s12  ;;  %s2429_s22 = smov %s1839_s23 }
 0x3b7   : > { %s2430_s23 = smov %s2049_s4  ;;  %s2431_s24 = smov %s1851_s26 }
 0x3b8   : > { %s2432_s25 = smov %s1855_s27  ;;  %s2433_s26 = smov %s2419_s2 }
 0x3b9   : > { %s2434_s27 = smov %s2420_s30  ;;  %26 = sbr.rel (!%p2296_p6) target bundleno = 20 (0x14), region = 119 }
 0x3be   :  { %1025 = vsyncpa [#allocation4], 1 }
 0x3bf   :  { %1027 = vsyncpa [#allocation4 + $0x1], 1 }
 0x3c0   :  { %1028 = vsyncpa [#allocation7], 1 }
 0x3c1   :  { %1030 = vsyncpa [#allocation7 + $0x1], 1 }
 0x3c2   :  { %1031 = vsyncpa [#allocation5], 1 }
 0x3c3   :  { %1033 = vsyncpa [#allocation5 + $0x1], 1 }
 0x3c4   :  { %1034 = vsyncpa [#allocation11], 1 }
 0x3c5   :  { %1036 = vsyncpa [#allocation11 + $0x1], 1 }

</bundles_post_ra>
